<compile_context>
chip_gen: v5e
topology: v5e:2x2
jax: 0.10.0
libtpu: 0.0.40
codegen_flags: <defaults>
</compile_context>

<pallas_src>
from functools import partial

import jax
import jax.numpy as jnp
from jax.experimental import pallas as pl
from jax.experimental.pallas import tpu as pltpu


def _mlp_kernel(x_ref, w1_ref, b1_ref, w2_ref, b2_ref, o_ref):
    # x:  (TB, d_in)        w1: (hidden, d_in)   b1: (hidden, 1)
    # w2: (d_out, hidden)   b2: (d_out, 1)       o:  (d_out, TB)   -- batch on lanes
    x = x_ref[...]

    # h = W1 @ x^T : contract d_in (axis 1 of both operands) -> (hidden, TB), lane-dense.
    h = jax.lax.dot_general(
        w1_ref[...], x,
        dimension_numbers=(((1,), (1,)), ((), ())),
        preferred_element_type=jnp.float32,
    ) + b1_ref[...]
    h = jnp.maximum(h, 0.0)                                        # ReLU

    # y = W2 @ h : (d_out, hidden) @ (hidden, TB) -> (d_out, TB), lane-dense output.
    y = jnp.dot(w2_ref[...], h, preferred_element_type=jnp.float32) + b2_ref[...]
    o_ref[...] = jnp.tanh(y) * 100.0


def _round_up(x, m):
    return (x + m - 1) // m * m


def prepare_params(w1, b1, w2, b2):
    """One-time param prep (f32 cast + bias reshape); keeps PyTorch weight layout."""
    return (
        jnp.asarray(w1, jnp.float32),                  # (hidden, d_in)
        jnp.asarray(b1, jnp.float32).reshape(-1, 1),   # (hidden, 1)
        jnp.asarray(w2, jnp.float32),                  # (d_out, hidden)
        jnp.asarray(b2, jnp.float32).reshape(-1, 1),   # (d_out, 1)
    )


@partial(jax.jit, static_argnames=("tb",))
def neural_controller_forward(x, params, tb=512):
    """x: (B, input_size) f32; params from prepare_params() -> (B, output_size) f32.

    tb: batch tile (rows per grid step).  Must be a multiple of 128 (batch lives on the
    lane axis inside the kernel).  512 rows keeps VMEM use tiny (< 1 MiB double-buffered,
    safe even under v7x's 64 MiB VMEM) while being big enough to reach the HBM roofline.
    """
    w1, b1, w2, b2 = params
    B, d_in = x.shape
    hidden = w1.shape[0]
    d_out = w2.shape[0]

    # Tile size: multiple of 128, no bigger than the (lane-rounded) batch.
    tb = max(128, min(tb, _round_up(B, 128)))
    b_pad = _round_up(B, tb)

    x_f = jnp.asarray(x, jnp.float32)
    if b_pad != B:
        x_f = jnp.pad(x_f, ((0, b_pad - B), (0, 0)))   # ragged last tile -> zero pad

    n_blocks = pl.cdiv(b_pad, tb)

    out_t = pl.pallas_call(
        _mlp_kernel,
        out_shape=jax.ShapeDtypeStruct((d_out, b_pad), jnp.float32),
        grid=(n_blocks,),
        in_specs=[
            pl.BlockSpec((tb, d_in), lambda i: (i, 0)),        # batch-tiled input
            pl.BlockSpec((hidden, d_in), lambda i: (0, 0)),    # weights stay resident
            pl.BlockSpec((hidden, 1), lambda i: (0, 0)),
            pl.BlockSpec((d_out, hidden), lambda i: (0, 0)),
            pl.BlockSpec((d_out, 1), lambda i: (0, 0)),
        ],
        out_specs=pl.BlockSpec((d_out, tb), lambda i: (0, i)), # lane-dense output tile
        compiler_params=pltpu.CompilerParams(
            dimension_semantics=("parallel",),                 # v7x: shard batch over 2 TCs
        ),
    )(x_f, w1, b1, w2, b2)

    # (d_out, b_pad) -> (B, d_out); single small transpose in the wrapper.
    return out_t[:, :B].T


def _reference(x, w1, b1, w2, b2):
    h = jnp.maximum(x @ w1.T + b1, 0.0)
    return jnp.tanh(h @ w2.T + b2) * 100.0


if __name__ == "__main__":
    key = jax.random.PRNGKey(0)
    input_size, hidden, output_size = 32, 16, 8

    k_x, k_w1, k_b1, k_w2, k_b2, k_x2 = jax.random.split(key, 6)

    # Deterministic PyTorch-like init: uniform(-1/sqrt(fan_in), 1/sqrt(fan_in)).
    lim1 = 1.0 / jnp.sqrt(jnp.float32(input_size))
    lim2 = 1.0 / jnp.sqrt(jnp.float32(hidden))
    w1 = jax.random.uniform(k_w1, (hidden, input_size), jnp.float32, -lim1, lim1)
    b1 = jax.random.uniform(k_b1, (hidden,), jnp.float32, -lim1, lim1)
    w2 = jax.random.uniform(k_w2, (output_size, hidden), jnp.float32, -lim2, lim2)
    b2 = jax.random.uniform(k_b2, (output_size,), jnp.float32, -lim2, lim2)

    params = prepare_params(w1, b1, w2, b2)

    # Small batch (single grid step; batch padded to one 128-lane tile).
    x_small = jax.random.normal(k_x, (4, input_size), dtype=jnp.float32)
    out_small = neural_controller_forward(x_small, params)
    jax.block_until_ready(out_small)
    ref_small = _reference(x_small, w1, b1, w2, b2)
    assert out_small.shape == (4, output_size)
    assert jnp.allclose(out_small, ref_small, atol=1e-3, rtol=1e-4), "small-batch mismatch"

    # Ragged batch spanning several grid steps (exercises pipelining + padding path).
    x_big = jax.random.normal(k_x2, (300, input_size), dtype=jnp.float32)
    out_big = neural_controller_forward(x_big, params, tb=128)
    jax.block_until_ready(out_big)
    ref_big = _reference(x_big, w1, b1, w2, b2)
    assert out_big.shape == (300, output_size)
    assert jnp.allclose(out_big, ref_big, atol=1e-3, rtol=1e-4), "multi-tile mismatch"

    print("KERNEL_OK")
</pallas_src>

<mosaic_0001>
module attributes {stable_mosaic.version = 11 : i64} {
  func.func @_mlp_kernel(%arg0: i32, %arg1: memref<128x32xf32, #tpu.memory_space<vmem>>, %arg2: memref<16x32xf32, #tpu.memory_space<vmem>>, %arg3: memref<16x1xf32, #tpu.memory_space<vmem>>, %arg4: memref<8x16xf32, #tpu.memory_space<vmem>>, %arg5: memref<8x1xf32, #tpu.memory_space<vmem>>, %arg6: memref<8x128xf32, #tpu.memory_space<vmem>>) attributes {dimension_semantics = [#tpu.dimension_semantics<parallel>], iteration_bounds = array<i64: 1>, scalar_prefetch = 0 : i64, scratch_operands = 0 : i64, tpu.core_type = #tpu.core_type<tc>, window_params = [{transform_indices = @transform_0, window_bounds = array<i64: 128, 32>}, {pipeline_mode = #tpu.pipeline_mode<synchronous>, transform_indices = @transform_1, window_bounds = array<i64: 16, 32>}, {pipeline_mode = #tpu.pipeline_mode<synchronous>, transform_indices = @transform_2, window_bounds = array<i64: 16, 1>}, {pipeline_mode = #tpu.pipeline_mode<synchronous>, transform_indices = @transform_3, window_bounds = array<i64: 8, 16>}, {pipeline_mode = #tpu.pipeline_mode<synchronous>, transform_indices = @transform_4, window_bounds = array<i64: 8, 1>}, {transform_indices = @transform_5, window_bounds = array<i64: 8, 128>}]} {
    %c0 = arith.constant 0 : index
    %c0_0 = arith.constant 0 : index
    %0 = vector.load %arg1[%c0, %c0_0] : memref<128x32xf32, #tpu.memory_space<vmem>>, vector<128x32xf32>
    %c0_1 = arith.constant 0 : index
    %c0_2 = arith.constant 0 : index
    %1 = vector.load %arg2[%c0_1, %c0_2] : memref<16x32xf32, #tpu.memory_space<vmem>>, vector<16x32xf32>
    %cst = arith.constant dense<0.000000e+00> : vector<16x128xf32>
    %2 = tpu.matmul %1, %0, %cst {dimension_numbers = #tpu.dot_dimension_numbers<[1], [1], [0], [0], [0, 0, 1, 0], [], []>} : vector<16x32xf32>, vector<128x32xf32>, vector<16x128xf32> -> vector<16x128xf32>
    %c0_3 = arith.constant 0 : index
    %c0_4 = arith.constant 0 : index
    %3 = vector.load %arg3[%c0_3, %c0_4] : memref<16x1xf32, #tpu.memory_space<vmem>>, vector<16x1xf32>
    %4 = vector.broadcast %3 : vector<16x1xf32> to vector<16x128xf32>
    %5 = arith.addf %2, %4 : vector<16x128xf32>
    %cst_5 = arith.constant 0.000000e+00 : f32
    %6 = vector.broadcast %cst_5 : f32 to vector<16x128xf32>
    %7 = arith.maximumf %5, %6 : vector<16x128xf32>
    %c0_6 = arith.constant 0 : index
    %c0_7 = arith.constant 0 : index
    %8 = vector.load %arg4[%c0_6, %c0_7] : memref<8x16xf32, #tpu.memory_space<vmem>>, vector<8x16xf32>
    %cst_8 = arith.constant dense<0.000000e+00> : vector<8x128xf32>
    %9 = tpu.matmul %8, %7, %cst_8 {dimension_numbers = #tpu.dot_dimension_numbers<[1], [0], [0], [1], [0, 0, 1, 1], [], []>} : vector<8x16xf32>, vector<16x128xf32>, vector<8x128xf32> -> vector<8x128xf32>
    %c0_9 = arith.constant 0 : index
    %c0_10 = arith.constant 0 : index
    %10 = vector.load %arg5[%c0_9, %c0_10] : memref<8x1xf32, #tpu.memory_space<vmem>>, vector<8x1xf32>
    %11 = vector.broadcast %10 : vector<8x1xf32> to vector<8x128xf32>
    %12 = arith.addf %9, %11 : vector<8x128xf32>
    %13 = math.tanh %12 : vector<8x128xf32>
    %cst_11 = arith.constant 1.000000e+02 : f32
    %14 = vector.broadcast %cst_11 : f32 to vector<8x128xf32>
    %15 = arith.mulf %13, %14 : vector<8x128xf32>
    %c0_12 = arith.constant 0 : index
    %c0_13 = arith.constant 0 : index
    %16 = vector.load %arg6[%c0_12, %c0_13] : memref<8x128xf32, #tpu.memory_space<vmem>>, vector<8x128xf32>
    tpu.vector_store %arg6[%c0_12, %c0_13], %15 {strides = array<i32>} : memref<8x128xf32, #tpu.memory_space<vmem>>, vector<8x128xf32>,
    return
  }
  func.func @transform_0(%arg0: i32) -> (i32, i32) {
    %c0_i32 = arith.constant 0 : i32
    %c0_i32_0 = arith.constant 0 : i32
    return %arg0, %c0_i32 : i32, i32
  }
  func.func @transform_1(%arg0: i32) -> (i32, i32) {
    %c0_i32 = arith.constant 0 : i32
    %c0_i32_0 = arith.constant 0 : i32
    %c0_i32_1 = arith.constant 0 : i32
    return %c0_i32, %c0_i32_0 : i32, i32
  }
  func.func @transform_2(%arg0: i32) -> (i32, i32) {
    %c0_i32 = arith.constant 0 : i32
    %c0_i32_0 = arith.constant 0 : i32
    %c0_i32_1 = arith.constant 0 : i32
    return %c0_i32, %c0_i32_0 : i32, i32
  }
  func.func @transform_3(%arg0: i32) -> (i32, i32) {
    %c0_i32 = arith.constant 0 : i32
    %c0_i32_0 = arith.constant 0 : i32
    %c0_i32_1 = arith.constant 0 : i32
    return %c0_i32, %c0_i32_0 : i32, i32
  }
  func.func @transform_4(%arg0: i32) -> (i32, i32) {
    %c0_i32 = arith.constant 0 : i32
    %c0_i32_0 = arith.constant 0 : i32
    %c0_i32_1 = arith.constant 0 : i32
    return %c0_i32, %c0_i32_0 : i32, i32
  }
  func.func @transform_5(%arg0: i32) -> (i32, i32) {
    %c0_i32 = arith.constant 0 : i32
    %c0_i32_0 = arith.constant 0 : i32
    return %c0_i32, %arg0 : i32, i32
  }
}

</mosaic_0001>

<bundles_post_ra>
// kernel: neural_controller_forward.1
= control target key start
LH: loop header
LB: loop body
LE: loop exit
PB: predicated region body
PF: predicated region fallthrough
CT: control target
= control target key end

     0   :  { %vm50_vm0 = vcmask 261120   ;;  %v208_v11 = vmov 0   ;;  %vm137_vm1 = vcmask 130048   ;;  %s342_s0 = inlined_call_operand.vmem [shape: f32[128,32], index: 0, kind: input, shape index: {}]   ;;  %s343_s2 = inlined_call_operand.vmem [shape: f32[16,1], index: 2, kind: input, shape index: {}]   ;;  %s344_s1 = inlined_call_operand.vmem [shape: f32[16,32], index: 1, kind: input, shape index: {}]   ;;  %s345_s4 = inlined_call_operand.vmem [shape: f32[8,1], index: 4, kind: input, shape index: {}]   ;;  %s346_s3 = inlined_call_operand.vmem [shape: f32[8,16], index: 3, kind: input, shape index: {}]   ;;  %s347_s5 = inlined_call_operand.vmem [shape: f32[8,128], index: 5, kind: output, shape index: {}]  }
   0x1   :  { %v35_v0 = vld [vmem:[%s342_s0 + $0x78] sm:$0xff]  ;;  %v34_v1 = vld [vmem:[%s342_s0 + $0x70] sm:$0xff]  ;;  %v33_v2 = vld [vmem:[%s342_s0 + $0x68] sm:$0xff]  ;;  %204 = vset.pattern.permute.xlu0 %v208_v11  ;;  %205 = vset.pattern.permute.xlu1 %v208_v11 }
   0x2   :  { %168 = vmatpush.xpose.msk.msra.mxu0 %vm50_vm0, %v35_v0  ;;  %187 = vmatpush.xpose.msk.msra.mxu2 %vm50_vm0, %v35_v0  ;;  %v32_v3 = vld [vmem:[%s342_s0 + $0x60] sm:$0xff]  ;;  %v31_v4 = vld [vmem:[%s342_s0 + $0x58] sm:$0xff]  ;;  %v30_v5 = vld [vmem:[%s342_s0 + $0x50] sm:$0xff] }
   0x3   :  { %v29_v6 = vld [vmem:[%s342_s0 + $0x48] sm:$0xff]  ;;  %v28_v7 = vld [vmem:[%s342_s0 + $0x40] sm:$0xff]  ;;  %v27_v8 = vld [vmem:[%s342_s0 + $0x38] sm:$0xff] }
   0x4   :  { %v39_v9 = vld [vmem:[%s343_s2 + $0x8] sm:$0xff]  ;;  %v26_v10 = vld [vmem:[%s342_s0 + $0x30] sm:$0xff]  ;;  %v38_v13 = vld [vmem:[%s343_s2] sm:$0xff] }
   0x5   :  { %47 = vperm.xlu0 %204, %v39_v9   ;;  %v25_v12 = vld [vmem:[%s342_s0 + $0x28] sm:$0xff]  ;;  %v24_v14 = vld [vmem:[%s342_s0 + $0x20] sm:$0xff]  ;;  %v23_v15 = vld [vmem:[%s342_s0 + $0x18] sm:$0xff] }
   0x6   :  { %169 = vmatpush.xpose.msk.msra.mxu0 %vm50_vm0, %v34_v1  ;;  %188 = vmatpush.xpose.msk.msra.mxu2 %vm50_vm0, %v34_v1  ;;  %v22_v16 = vld [vmem:[%s342_s0 + $0x10] sm:$0xff]  ;;  %v21_v17 = vld [vmem:[%s342_s0 + $0x8] sm:$0xff]  ;;  %v20_v18 = vld [vmem:[%s342_s0] sm:$0xff] }
   0x7   :  { %v36_v19 = vld [vmem:[%s344_s1] sm:$0xff]  ;;  %v37_v20 = vld [vmem:[%s344_s1 + $0x8] sm:$0xff] }
   0x8   :  { %v131_v21 = vld [vmem:[%s345_s4] sm:$0xff] }
   0x9   :  { %134 = vperm.xlu1 %205, %v131_v21   ;;  %v130_v30 = vld [vmem:[%s346_s3] sm:$0xff] }
   0xa   :  { %170 = vmatpush.xpose.msk.msra.mxu0 %vm50_vm0, %v33_v2  ;;  %189 = vmatpush.xpose.msk.msra.mxu2 %vm50_vm0, %v33_v2 }
   0xd   :  { %42 = vperm.xlu0 %204, %v38_v13  }
   0xe   :  { %171 = vmatpush.xpose.msk.msra.mxu0 %vm50_vm0, %v32_v3  ;;  %190 = vmatpush.xpose.msk.msra.mxu2 %vm50_vm0, %v32_v3 }
  0x12   :  { %172 = vmatpush.xpose.msk.msra.mxu0 %vm50_vm0, %v31_v4  ;;  %191 = vmatpush.xpose.msk.msra.mxu2 %vm50_vm0, %v31_v4 }
  0x16   :  { %173 = vmatpush.xpose.msk.msra.mxu0 %vm50_vm0, %v30_v5  ;;  %192 = vmatpush.xpose.msk.msra.mxu2 %vm50_vm0, %v30_v5 }
  0x1a   :  { %174 = vmatpush.xpose.msk.msra.mxu0 %vm50_vm0, %v29_v6  ;;  %193 = vmatpush.xpose.msk.msra.mxu2 %vm50_vm0, %v29_v6 }
  0x1e   :  { %175 = vmatpush.xpose.msk.msra.mxu0 %vm50_vm0, %v28_v7  ;;  %194 = vmatpush.xpose.msk.msra.mxu2 %vm50_vm0, %v28_v7 }
  0x22   :  { %176 = vmatpush.xpose.msk.msra.mxu0 %vm50_vm0, %v27_v8  ;;  %195 = vmatpush.xpose.msk.msra.mxu2 %vm50_vm0, %v27_v8 }
  0x26   :  { %177 = vmatpush.xpose.msk.msra.mxu0 %vm50_vm0, %v26_v10  ;;  %196 = vmatpush.xpose.msk.msra.mxu2 %vm50_vm0, %v26_v10 }
  0x2a   :  { %178 = vmatpush.xpose.msk.msra.mxu0 %vm50_vm0, %v25_v12  ;;  %197 = vmatpush.xpose.msk.msra.mxu2 %vm50_vm0, %v25_v12 }
  0x2e   :  { %179 = vmatpush.xpose.msk.msra.mxu0 %vm50_vm0, %v24_v14  ;;  %198 = vmatpush.xpose.msk.msra.mxu2 %vm50_vm0, %v24_v14 }
  0x32   :  { %180 = vmatpush.xpose.msk.msra.mxu0 %vm50_vm0, %v23_v15  ;;  %199 = vmatpush.xpose.msk.msra.mxu2 %vm50_vm0, %v23_v15 }
  0x36   :  { %181 = vmatpush.xpose.msk.msra.mxu0 %vm50_vm0, %v22_v16  ;;  %200 = vmatpush.xpose.msk.msra.mxu2 %vm50_vm0, %v22_v16 }
  0x3a   :  { %182 = vmatpush.xpose.msk.msra.mxu0 %vm50_vm0, %v21_v17  ;;  %201 = vmatpush.xpose.msk.msra.mxu2 %vm50_vm0, %v21_v17 }
  0x3e   :  { %183 = vmatpush.xpose.msk.msra.mxu0 %vm50_vm0, %v20_v18  ;;  %202 = vmatpush.xpose.msk.msra.mxu2 %vm50_vm0, %v20_v18 }
  0x41   :  { %184 = vmatmul.msk.f32.vlgmr.msra.gmra.mxu0 %vm50_vm0, %v36_v19  ;;  %185 = vmatmul.msk.f32.vlgmr.msra.gmra.mxu2 %vm50_vm0, %v37_v20 }
  0x77   :  { %v48_v22 = vpop.permute.xlu0 %47 }
  0x7b   :  { %v135_v31 = vpop.permute.xlu1 %134 }
  0x7f   :  { %v43_v23 = vpop.permute.xlu0 %42 }
  0xbe   :  { %v122_v24 = vpop.f32.mrf.mxu0 }
  0xbf   :  { %v123_v26 = vadd.f32 %v122_v24, %v43_v23 }
  0xc1   :  { %v128_v29 = vmax.f32 %v123_v26, 0.0 }
  0xc4   :  { %v125_v25 = vpop.f32.mrf.mxu2 }
  0xc5   :  { %v126_v27 = vadd.f32 %v125_v25, %v48_v22 }
  0xc7   :  { %v129_v28 = vmax.f32 %v126_v27, 0.0 }
  0xc9   :  { %155 = vmatpush.msra.mxu1 %v129_v28 }
  0xcb   :  { %156 = vmatpush.msra.mxu1 %v128_v29 }
  0xcc   :  { %186 = vmatmul.msk.f32.vlgmr.msra.gmra.mxu1 %vm137_vm1, %v130_v30 }
 0x149   :  { %v158_v32 = vpop.f32.mrf.mxu1 }
 0x14a   :  { %v159_v33 = vadd.f32 %v158_v32, %v135_v31 }
 0x14c   :  { %206 = vtanh.f32 %v159_v33 }
 0x152   :  { %v207_v34 = vpop.eup %206 }
 0x153   :  { %v162_v35 = vmul.f32 100.0, %v207_v34 }
 0x155   :  { %163 = vst [vmem:[%s347_s5] sm:$0xff] %v162_v35 }

</bundles_post_ra>
